<compile_context>
chip_gen: v6e
topology: v6e:2x2x1
jax: 0.10.0
libtpu: 0.0.40
codegen_flags: <defaults>
</compile_context>

<pallas_src>
import functools
import math

import jax
import jax.numpy as jnp
from jax import lax
from jax.experimental import pallas as pl
from jax.experimental.pallas import tpu as pltpu


_VMEM_LIMIT_BYTES = 48 * 1024 * 1024  # explicit; leaves headroom under v7x's 64 MiB


def _row_tile(dim, target=256, align=8):
    """Row (sublane) tile: largest divisor of `dim` that is a multiple of
    `align` and <= target; otherwise the full dim (always layout-legal)."""
    if dim <= target:
        return dim
    t = (target // align) * align
    while t >= align:
        if dim % t == 0:
            return t
        t -= align
    return dim


# ----------------------------------------------------------------------------
# Kernel 1: fused Q/K/V projections  (y_i = x_i @ W_i^T + b_i, i in {q,k,v})
# Weights arrive pre-transposed as (3, d_in, d_out) bf16 and stay VMEM-resident
# across the whole grid.  1/sqrt(d_k) is pre-folded into W_q / b_q.
# ----------------------------------------------------------------------------
def _qkv_proj_kernel(xq_ref, xk_ref, xv_ref, w_ref, b_ref, q_ref, k_ref, v_ref):
    xq = xq_ref[...].astype(jnp.bfloat16)
    xk = xk_ref[...].astype(jnp.bfloat16)
    xv = xv_ref[...].astype(jnp.bfloat16)
    q = jnp.dot(xq, w_ref[0], preferred_element_type=jnp.float32) + b_ref[0]
    k = jnp.dot(xk, w_ref[1], preferred_element_type=jnp.float32) + b_ref[1]
    v = jnp.dot(xv, w_ref[2], preferred_element_type=jnp.float32) + b_ref[2]
    q_ref[...] = q.astype(q_ref.dtype)
    k_ref[...] = k.astype(k_ref.dtype)
    v_ref[...] = v.astype(v_ref.dtype)


def _qkv_proj_shared_kernel(x_ref, w_ref, b_ref, q_ref, k_ref, v_ref):
    x = x_ref[...].astype(jnp.bfloat16)   # cast once, reuse for all three matmuls
    q_ref[...] = (jnp.dot(x, w_ref[0], preferred_element_type=jnp.float32)
                  + b_ref[0]).astype(q_ref.dtype)
    k_ref[...] = (jnp.dot(x, w_ref[1], preferred_element_type=jnp.float32)
                  + b_ref[1]).astype(k_ref.dtype)
    v_ref[...] = (jnp.dot(x, w_ref[2], preferred_element_type=jnp.float32)
                  + b_ref[2]).astype(v_ref.dtype)


def _qkv_call(kernel, n_x, M, d_in, d_out, tm):
    x_spec = pl.BlockSpec((tm, d_in), lambda i: (i, 0))
    out_spec = pl.BlockSpec((tm, d_out), lambda i: (i, 0))
    out_sd = jax.ShapeDtypeStruct((M, d_out), jnp.bfloat16)
    # TODO(synk): add a K-tiled accumulator fallback for d_model too large for
    #             the full (3, d_in, d_out) weight to stay VMEM-resident.
    return pl.pallas_call(
        kernel,
        grid=(M // tm,),
        in_specs=[x_spec] * n_x
                 + [pl.BlockSpec((3, d_in, d_out), lambda i: (0, 0, 0)),
                    pl.BlockSpec((3, 1, d_out), lambda i: (0, 0, 0))],
        out_specs=(out_spec, out_spec, out_spec),
        out_shape=(out_sd, out_sd, out_sd),
        compiler_params=pltpu.CompilerParams(
            dimension_semantics=("parallel",),
            vmem_limit_bytes=_VMEM_LIMIT_BYTES),
    )


def qkv_projection(xq, xk, xv, w_qkv_t, b_qkv, *, tm=256):
    M, d_in = xq.shape
    d_out = w_qkv_t.shape[-1]
    tm = _row_tile(M, tm)
    return _qkv_call(_qkv_proj_kernel, 3, M, d_in, d_out, tm)(
        xq, xk, xv, w_qkv_t, b_qkv)


def qkv_projection_shared(x, w_qkv_t, b_qkv, *, tm=256):
    M, d_in = x.shape
    d_out = w_qkv_t.shape[-1]
    tm = _row_tile(M, tm)
    return _qkv_call(_qkv_proj_shared_kernel, 1, M, d_in, d_out, tm)(
        x, w_qkv_t, b_qkv)


# ----------------------------------------------------------------------------
# Kernel 2: scaled dot-product attention, grid = (B, H, S // tq).
# q/k/v are head-major (B, H, S, d_k) bf16; per-step attention-weights block
# is only (tq, S) f32.  Scale already folded into Q.
# ----------------------------------------------------------------------------
def _attention_kernel(q_ref, k_ref, v_ref, ctx_ref, attn_ref):
    # TODO(synk): additive mask (masked_fill(mask == 0, -1e9)) not wired in;
    #             the module's forward here is called with mask=None.
    # TODO(synk): for very large S, switch to a flash/online-softmax
    #             KV-streaming formulation instead of materializing (tq, S).
    s = lax.dot_general(q_ref[...], k_ref[...], (((1,), (1,)), ((), ())),
                        preferred_element_type=jnp.float32)          # (tq, S)
    m = jnp.max(s, axis=-1, keepdims=True)
    e = jnp.exp(s - m)
    p = e / jnp.sum(e, axis=-1, keepdims=True)                        # exact softmax
    attn_ref[...] = p
    ctx = jnp.dot(p.astype(v_ref.dtype), v_ref[...],
                  preferred_element_type=jnp.float32)                 # (tq, d_k)
    ctx_ref[...] = ctx.astype(ctx_ref.dtype)


def attention(q, k, v, *, tq=256):
    B, H, S, d_k = q.shape
    tq = _row_tile(S, tq)
    grid = (B, H, S // tq)
    q_spec = pl.BlockSpec((None, None, tq, d_k), lambda b, h, i: (b, h, i, 0))
    kv_spec = pl.BlockSpec((None, None, S, d_k), lambda b, h, i: (b, h, 0, 0))
    return pl.pallas_call(
        _attention_kernel,
        grid=grid,
        in_specs=[q_spec, kv_spec, kv_spec],
        out_specs=(pl.BlockSpec((None, None, tq, d_k), lambda b, h, i: (b, h, i, 0)),
                   pl.BlockSpec((None, None, tq, S), lambda b, h, i: (b, h, i, 0))),
        out_shape=(jax.ShapeDtypeStruct((B, H, S, d_k), jnp.bfloat16),
                   jax.ShapeDtypeStruct((B, H, S, S), jnp.float32)),
        compiler_params=pltpu.CompilerParams(
            dimension_semantics=("parallel", "parallel", "parallel"),
            vmem_limit_bytes=_VMEM_LIMIT_BYTES),
    )(q, k, v)


# ----------------------------------------------------------------------------
# Kernel 3: output projection + residual add + LayerNorm (eps=1e-6).
# Full (d, d) bf16 Wo stays VMEM-resident; LN stats in f32.
# ----------------------------------------------------------------------------
def _out_ln_kernel(x_ref, w_ref, b_ref, res_ref, g_ref, beta_ref, o_ref, *, eps):
    # dropout is identity in eval mode
    y = jnp.dot(x_ref[...], w_ref[...], preferred_element_type=jnp.float32)
    y = y + b_ref[...] + res_ref[...]
    mean = jnp.mean(y, axis=-1, keepdims=True)
    var = jnp.mean(jnp.square(y - mean), axis=-1, keepdims=True)
    o_ref[...] = ((y - mean) * lax.rsqrt(var + eps)) * g_ref[...] + beta_ref[...]


def out_proj_residual_layernorm(x2d, wo_t, bo, res2d, gamma, beta,
                                *, tm=256, eps=1e-6):
    M, d = x2d.shape
    tm = _row_tile(M, tm)
    kernel = functools.partial(_out_ln_kernel, eps=eps)
    # TODO(synk): K-tiled accumulator fallback for d_model too large for VMEM.
    return pl.pallas_call(
        kernel,
        grid=(M // tm,),
        in_specs=[pl.BlockSpec((tm, d), lambda i: (i, 0)),   # ctx rows (bf16)
                  pl.BlockSpec((d, d), lambda i: (0, 0)),    # Wo^T resident (bf16)
                  pl.BlockSpec((1, d), lambda i: (0, 0)),    # bias
                  pl.BlockSpec((tm, d), lambda i: (i, 0)),   # residual rows (f32)
                  pl.BlockSpec((1, d), lambda i: (0, 0)),    # LN gamma
                  pl.BlockSpec((1, d), lambda i: (0, 0))],   # LN beta
        out_specs=pl.BlockSpec((tm, d), lambda i: (i, 0)),
        out_shape=jax.ShapeDtypeStruct((M, d), jnp.float32),
        compiler_params=pltpu.CompilerParams(
            dimension_semantics=("parallel",),
            vmem_limit_bytes=_VMEM_LIMIT_BYTES),
    )(x2d, wo_t, bo, res2d, gamma, beta)


# ----------------------------------------------------------------------------
# Full MultiHeadAttention forward (layout plumbing in plain JAX, hot path Pallas)
# ----------------------------------------------------------------------------
def multi_head_attention(params, query, key, value):
    B, S, d_model = query.shape
    H = params["n_heads"]
    d_k = d_model // H

    q2d = query.reshape(B * S, d_model)      # also the residual (f32)
    if (key is query) and (value is query):
        # Self-attention: DMA the shared activation once instead of 3x.
        qp, kp, vp = qkv_projection_shared(q2d, params["w_qkv_t"], params["b_qkv"])
    else:
        qp, kp, vp = qkv_projection(q2d,
                                    key.reshape(B * S, d_model),
                                    value.reshape(B * S, d_model),
                                    params["w_qkv_t"], params["b_qkv"])

    # Head-major (B, H, S, d_k) so the attention kernel sees d_k-aligned,
    # full-lane blocks (no 64-lane-misaligned per-head slices in-kernel).
    def to_heads(x2d):
        return x2d.reshape(B, S, H, d_k).transpose(0, 2, 1, 3)

    ctx, attn = attention(to_heads(qp), to_heads(kp), to_heads(vp))

    ctx2d = ctx.transpose(0, 2, 1, 3).reshape(B * S, d_model)
    out = out_proj_residual_layernorm(ctx2d, params["wo_t"], params["bo"],
                                      q2d, params["ln_gamma"], params["ln_beta"])
    return out.reshape(B, S, d_model), attn


def init_params(key, n_heads, d_model):
    ks = jax.random.split(key, 8)
    bound = 1.0 / math.sqrt(d_model)
    d_k = d_model // n_heads

    def linear_wb(kw, kb):
        # nn.Linear semantics: y = x @ W^T + b ; store W^T = (d_in, d_out)
        # directly so no kernel ever transposes a weight tile.
        w_t = jax.random.uniform(kw, (d_model, d_model), jnp.float32, -bound, bound)
        b = jax.random.uniform(kb, (d_model,), jnp.float32, -bound, bound)
        return w_t, b

    wq_t, bq = linear_wb(ks[0], ks[1])
    wk_t, bk = linear_wb(ks[2], ks[3])
    wv_t, bv = linear_wb(ks[4], ks[5])
    wo_t, bo = linear_wb(ks[6], ks[7])

    # Fold the 1/sqrt(d_k) attention scale into the Q projection (one-time).
    scale = 1.0 / math.sqrt(d_k)
    wq_t = wq_t * scale
    bq = bq * scale

    return dict(
        n_heads=n_heads,
        # bf16 weights for the bf16-native MXU; biases stay f32 (post-acc add).
        w_qkv_t=jnp.stack([wq_t, wk_t, wv_t], 0).astype(jnp.bfloat16),  # (3, d_in, d_out)
        b_qkv=jnp.stack([bq, bk, bv], 0).reshape(3, 1, d_model),        # (3, 1, d_out) f32
        wo_t=wo_t.astype(jnp.bfloat16),
        bo=bo.reshape(1, d_model),
        ln_gamma=jnp.ones((1, d_model), jnp.float32),
        ln_beta=jnp.zeros((1, d_model), jnp.float32),
    )


if __name__ == "__main__":
    B, S, d_model, n_heads = 2, 8, 32, 4
    root = jax.random.PRNGKey(0)
    kparam, kq, kk_, kv = jax.random.split(root, 4)
    params = init_params(kparam, n_heads, d_model)
    query = jax.random.normal(kq, (B, S, d_model), jnp.float32)
    key_t = jax.random.normal(kk_, (B, S, d_model), jnp.float32)
    value = jax.random.normal(kv, (B, S, d_model), jnp.float32)

    # cross-attention path (3 distinct inputs)
    out, attn = multi_head_attention(params, query, key_t, value)
    jax.block_until_ready((out, attn))
    assert out.shape == (B, S, d_model) and attn.shape == (B, n_heads, S, S)
    assert bool(jnp.all(jnp.isfinite(out))) and bool(jnp.all(jnp.isfinite(attn)))
    # softmax rows normalize exactly (within fp rounding)
    row_sums = jnp.sum(attn, axis=-1)
    assert bool(jnp.all(jnp.abs(row_sums - 1.0) < 1e-3))

    # self-attention path (deduped shared-activation projection kernel)
    out_sa, attn_sa = multi_head_attention(params, query, query, query)
    jax.block_until_ready((out_sa, attn_sa))
    assert out_sa.shape == (B, S, d_model) and attn_sa.shape == (B, n_heads, S, S)
    assert bool(jnp.all(jnp.isfinite(out_sa)))

    print("KERNEL_OK")
</pallas_src>

<mosaic_0001>
module attributes {stable_mosaic.version = 11 : i64} {
  func.func @_qkv_proj_kernel(%arg0: i32, %arg1: memref<16x32xf32, #tpu.memory_space<vmem>>, %arg2: memref<16x32xf32, #tpu.memory_space<vmem>>, %arg3: memref<16x32xf32, #tpu.memory_space<vmem>>, %arg4: memref<3x32x32xbf16, #tpu.memory_space<vmem>>, %arg5: memref<3x1x32xf32, #tpu.memory_space<vmem>>, %arg6: memref<16x32xbf16, #tpu.memory_space<vmem>>, %arg7: memref<16x32xbf16, #tpu.memory_space<vmem>>, %arg8: memref<16x32xbf16, #tpu.memory_space<vmem>>) attributes {dimension_semantics = [#tpu.dimension_semantics<parallel>], iteration_bounds = array<i64: 1>, scalar_prefetch = 0 : i64, scratch_operands = 0 : i64, tpu.core_type = #tpu.core_type<tc>, window_params = [{transform_indices = @transform_0, window_bounds = array<i64: 16, 32>}, {transform_indices = @transform_1, window_bounds = array<i64: 16, 32>}, {transform_indices = @transform_2, window_bounds = array<i64: 16, 32>}, {pipeline_mode = #tpu.pipeline_mode<synchronous>, transform_indices = @transform_3, window_bounds = array<i64: 3, 32, 32>}, {pipeline_mode = #tpu.pipeline_mode<synchronous>, transform_indices = @transform_4, window_bounds = array<i64: 3, 1, 32>}, {transform_indices = @transform_5, window_bounds = array<i64: 16, 32>}, {transform_indices = @transform_6, window_bounds = array<i64: 16, 32>}, {transform_indices = @transform_7, window_bounds = array<i64: 16, 32>}]} {
    %c0 = arith.constant 0 : index
    %c0_0 = arith.constant 0 : index
    %0 = vector.load %arg1[%c0, %c0_0] : memref<16x32xf32, #tpu.memory_space<vmem>>, vector<16x32xf32>
    %1 = arith.truncf %0 : vector<16x32xf32> to vector<16x32xbf16>
    %c0_1 = arith.constant 0 : index
    %c0_2 = arith.constant 0 : index
    %2 = vector.load %arg2[%c0_1, %c0_2] : memref<16x32xf32, #tpu.memory_space<vmem>>, vector<16x32xf32>
    %3 = arith.truncf %2 : vector<16x32xf32> to vector<16x32xbf16>
    %c0_3 = arith.constant 0 : index
    %c0_4 = arith.constant 0 : index
    %4 = vector.load %arg3[%c0_3, %c0_4] : memref<16x32xf32, #tpu.memory_space<vmem>>, vector<16x32xf32>
    %5 = arith.truncf %4 : vector<16x32xf32> to vector<16x32xbf16>
    %c0_5 = arith.constant 0 : index
    %c0_6 = arith.constant 0 : index
    %c0_7 = arith.constant 0 : index
    %6 = vector.load %arg4[%c0_5, %c0_6, %c0_7] : memref<3x32x32xbf16, #tpu.memory_space<vmem>>, vector<1x32x32xbf16>
    %7 = vector.shape_cast %6 : vector<1x32x32xbf16> to vector<32x32xbf16>
    %cst = arith.constant dense<0.000000e+00> : vector<16x32xf32>
    %8 = tpu.matmul %1, %7, %cst {dimension_numbers = #tpu.dot_dimension_numbers<[1], [0], [0], [1], [0, 0, 1, 1], [], []>} : vector<16x32xbf16>, vector<32x32xbf16>, vector<16x32xf32> -> vector<16x32xf32>
    %c0_8 = arith.constant 0 : index
    %c0_9 = arith.constant 0 : index
    %c0_10 = arith.constant 0 : index
    %9 = vector.load %arg5[%c0_8, %c0_9, %c0_10] : memref<3x1x32xf32, #tpu.memory_space<vmem>>, vector<1x1x32xf32>
    %10 = vector.shape_cast %9 : vector<1x1x32xf32> to vector<1x32xf32>
    %11 = vector.broadcast %10 : vector<1x32xf32> to vector<16x32xf32>
    %12 = arith.addf %8, %11 : vector<16x32xf32>
    %c1 = arith.constant 1 : index
    %c0_11 = arith.constant 0 : index
    %c0_12 = arith.constant 0 : index
    %13 = vector.load %arg4[%c1, %c0_11, %c0_12] : memref<3x32x32xbf16, #tpu.memory_space<vmem>>, vector<1x32x32xbf16>
    %14 = vector.shape_cast %13 : vector<1x32x32xbf16> to vector<32x32xbf16>
    %cst_13 = arith.constant dense<0.000000e+00> : vector<16x32xf32>
    %15 = tpu.matmul %3, %14, %cst_13 {dimension_numbers = #tpu.dot_dimension_numbers<[1], [0], [0], [1], [0, 0, 1, 1], [], []>} : vector<16x32xbf16>, vector<32x32xbf16>, vector<16x32xf32> -> vector<16x32xf32>
    %c1_14 = arith.constant 1 : index
    %c0_15 = arith.constant 0 : index
    %c0_16 = arith.constant 0 : index
    %16 = vector.load %arg5[%c1_14, %c0_15, %c0_16] : memref<3x1x32xf32, #tpu.memory_space<vmem>>, vector<1x1x32xf32>
    %17 = vector.shape_cast %16 : vector<1x1x32xf32> to vector<1x32xf32>
    %18 = vector.broadcast %17 : vector<1x32xf32> to vector<16x32xf32>
    %19 = arith.addf %15, %18 : vector<16x32xf32>
    %c2 = arith.constant 2 : index
    %c0_17 = arith.constant 0 : index
    %c0_18 = arith.constant 0 : index
    %20 = vector.load %arg4[%c2, %c0_17, %c0_18] : memref<3x32x32xbf16, #tpu.memory_space<vmem>>, vector<1x32x32xbf16>
    %21 = vector.shape_cast %20 : vector<1x32x32xbf16> to vector<32x32xbf16>
    %cst_19 = arith.constant dense<0.000000e+00> : vector<16x32xf32>
    %22 = tpu.matmul %5, %21, %cst_19 {dimension_numbers = #tpu.dot_dimension_numbers<[1], [0], [0], [1], [0, 0, 1, 1], [], []>} : vector<16x32xbf16>, vector<32x32xbf16>, vector<16x32xf32> -> vector<16x32xf32>
    %c2_20 = arith.constant 2 : index
    %c0_21 = arith.constant 0 : index
    %c0_22 = arith.constant 0 : index
    %23 = vector.load %arg5[%c2_20, %c0_21, %c0_22] : memref<3x1x32xf32, #tpu.memory_space<vmem>>, vector<1x1x32xf32>
    %24 = vector.shape_cast %23 : vector<1x1x32xf32> to vector<1x32xf32>
    %25 = vector.broadcast %24 : vector<1x32xf32> to vector<16x32xf32>
    %26 = arith.addf %22, %25 : vector<16x32xf32>
    %27 = arith.truncf %12 : vector<16x32xf32> to vector<16x32xbf16>
    %c0_23 = arith.constant 0 : index
    %c0_24 = arith.constant 0 : index
    %28 = vector.load %arg6[%c0_23, %c0_24] : memref<16x32xbf16, #tpu.memory_space<vmem>>, vector<16x32xbf16>
    tpu.vector_store %arg6[%c0_23, %c0_24], %27 {strides = array<i32>} : memref<16x32xbf16, #tpu.memory_space<vmem>>, vector<16x32xbf16>,
    %29 = arith.truncf %19 : vector<16x32xf32> to vector<16x32xbf16>
    %c0_25 = arith.constant 0 : index
    %c0_26 = arith.constant 0 : index
    %30 = vector.load %arg7[%c0_25, %c0_26] : memref<16x32xbf16, #tpu.memory_space<vmem>>, vector<16x32xbf16>
    tpu.vector_store %arg7[%c0_25, %c0_26], %29 {strides = array<i32>} : memref<16x32xbf16, #tpu.memory_space<vmem>>, vector<16x32xbf16>,
    %31 = arith.truncf %26 : vector<16x32xf32> to vector<16x32xbf16>
    %c0_27 = arith.constant 0 : index
    %c0_28 = arith.constant 0 : index
    %32 = vector.load %arg8[%c0_27, %c0_28] : memref<16x32xbf16, #tpu.memory_space<vmem>>, vector<16x32xbf16>
    tpu.vector_store %arg8[%c0_27, %c0_28], %31 {strides = array<i32>} : memref<16x32xbf16, #tpu.memory_space<vmem>>, vector<16x32xbf16>,
    return
  }
  func.func @transform_0(%arg0: i32) -> (i32, i32) {
    %c0_i32 = arith.constant 0 : i32
    %c0_i32_0 = arith.constant 0 : i32
    return %arg0, %c0_i32 : i32, i32
  }
  func.func @transform_1(%arg0: i32) -> (i32, i32) {
    %c0_i32 = arith.constant 0 : i32
    %c0_i32_0 = arith.constant 0 : i32
    return %arg0, %c0_i32 : i32, i32
  }
  func.func @transform_2(%arg0: i32) -> (i32, i32) {
    %c0_i32 = arith.constant 0 : i32
    %c0_i32_0 = arith.constant 0 : i32
    return %arg0, %c0_i32 : i32, i32
  }
  func.func @transform_3(%arg0: i32) -> (i32, i32, i32) {
    %c0_i32 = arith.constant 0 : i32
    %c0_i32_0 = arith.constant 0 : i32
    %c0_i32_1 = arith.constant 0 : i32
    %c0_i32_2 = arith.constant 0 : i32
    return %c0_i32, %c0_i32_0, %c0_i32_1 : i32, i32, i32
  }
  func.func @transform_4(%arg0: i32) -> (i32, i32, i32) {
    %c0_i32 = arith.constant 0 : i32
    %c0_i32_0 = arith.constant 0 : i32
    %c0_i32_1 = arith.constant 0 : i32
    %c0_i32_2 = arith.constant 0 : i32
    return %c0_i32, %c0_i32_0, %c0_i32_1 : i32, i32, i32
  }
  func.func @transform_5(%arg0: i32) -> (i32, i32) {
    %c0_i32 = arith.constant 0 : i32
    %c0_i32_0 = arith.constant 0 : i32
    return %arg0, %c0_i32 : i32, i32
  }
  func.func @transform_6(%arg0: i32) -> (i32, i32) {
    %c0_i32 = arith.constant 0 : i32
    %c0_i32_0 = arith.constant 0 : i32
    return %arg0, %c0_i32 : i32, i32
  }
  func.func @transform_7(%arg0: i32) -> (i32, i32) {
    %c0_i32 = arith.constant 0 : i32
    %c0_i32_0 = arith.constant 0 : i32
    return %arg0, %c0_i32 : i32, i32
  }
}

</mosaic_0001>

<bundles_post_ra>
// kernel: tpu_custom_call.1
= control target key start
LH: loop header
LB: loop body
LE: loop exit
PB: predicated region body
PF: predicated region fallthrough
CT: control target
= control target key end

     0   :  { %13 = vsyncpa [#allocation3], 0  ;;  %s709_s0 = inlined_call_operand.hbm [shape: f32[16,32], index: 0, kind: input, shape index: {}]   ;;  %s710_s1 = inlined_call_operand.hbm [shape: f32[16,32], index: 1, kind: input, shape index: {}]   ;;  %s711_s2 = inlined_call_operand.hbm [shape: f32[16,32], index: 2, kind: input, shape index: {}]   ;;  %s712_s3 = inlined_call_operand.hbm [shape: bf16[3,32,32], index: 3, kind: input, shape index: {}]   ;;  %s713_s4 = inlined_call_operand.vmem [shape: f32[3,1,32], index: 4, kind: input, shape index: {}]   ;;  %s714_s5 = inlined_call_operand.hbm [shape: bf16[16,32], index: 5, kind: output, shape index: {0}]   ;;  %s715_s6 = inlined_call_operand.hbm [shape: bf16[16,32], index: 6, kind: output, shape index: {1}]   ;;  %s716_s7 = inlined_call_operand.hbm [shape: bf16[16,32], index: 7, kind: output, shape index: {2}]  }
   0x1   :  { %14 = vsyncpa [#allocation6], 0 }
   0x2   :  { %15 = vsyncpa [#allocation9], 0 }
   0x3   :  { %16 = vsyncpa [#allocation4], 0 }
   0x4   :  { %17 = vsyncpa [#allocation12], 0  ;;  %s605_s24 = smov [#allocation5]   ;;  %s606_s26 = smov [#allocation2]  }
   0x5   :  { %s35_s25 = sshll.u32 %s605_s24, 4  ;;  %s23_s27 = sshll.u32 %s606_s26, 4  ;;  %s36_s25 = int_to_ptr.vmem [resolvable:$true] %s35_s25  ;;  %s24_s27 = int_to_ptr.vmem [resolvable:$true] %s23_s27 }
   0x6   :  { %s463_s28 = scalar_lea.vmem %s36_s25, 256  ;;  %p468_p1 = scmp.lt.s32.totalorder %s36_s25, %s36_s25 }
   0x7   :  { %p464_p0 = scmp.ne.s32.totalorder %s36_s25, %s463_s28  ;;  %p469_p2 = scmp.lt.s32.totalorder %s463_s28, %s463_s28 }
   0x9   :  { %p470_p3 = por %p469_p2, %p468_p1 }
   0xb   :  { %p471_p4 = pnand %p470_p3, %p464_p0 }
   0xd   :  { %474 = shalt.err (!%p471_p4)
}
   0xe   :  { %s607_s29 = smov 128   ;;  %s608_s30 = smov 8  }
   0xf   :  { %41 = dma.hbm_to_vmem [thread:$0]  %s710_s1, 256, %s36_s25, [#allocation6], %s607_s29, %s607_s29, %s608_s30  }
  0x10   :  { %s483_s10 = scalar_lea.vmem %s24_s27, 256  ;;  %p488_p6 = scmp.lt.s32.totalorder %s24_s27, %s24_s27 }
  0x11   :  { %p484_p5 = scmp.ne.s32.totalorder %s24_s27, %s483_s10  ;;  %p489_p7 = scmp.lt.s32.totalorder %s483_s10, %s483_s10 }
  0x13   :  { %p490_p8 = por %p489_p7, %p488_p6 }
  0x15   :  { %p491_p9 = pnand %p490_p8, %p484_p5 }
  0x17   :  { %494 = shalt.err (!%p491_p9)
}
  0x18   :  { %29 = dma.hbm_to_vmem [thread:$0]  %s709_s0, 256, %s24_s27, [#allocation3], %s607_s29, %s607_s29, %s608_s30  }
  0x19   :  { %s609_s13 = smov [#allocation7]   ;;  %s610_s15 = smov [#allocation8]  }
  0x1a   :  { %s47_s14 = sshll.u32 %s609_s13, 4  ;;  %s59_s16 = sshll.u32 %s610_s15, 4  ;;  %s48_s14 = int_to_ptr.vmem [resolvable:$true] %s47_s14  ;;  %s60_s16 = int_to_ptr.vmem [resolvable:$true] %s59_s16 }
  0x1b   :  { %s503_s17 = scalar_lea.vmem %s48_s14, 256  ;;  %p508_p11 = scmp.lt.s32.totalorder %s48_s14, %s48_s14 }
  0x1c   :  { %p504_p10 = scmp.ne.s32.totalorder %s48_s14, %s503_s17  ;;  %p509_p12 = scmp.lt.s32.totalorder %s503_s17, %s503_s17 }
  0x1e   :  { %p510_p13 = por %p509_p12, %p508_p11 }
  0x20   :  { %p511_p0 = pnand %p510_p13, %p504_p10 }
  0x22   :  { %514 = shalt.err (!%p511_p0)
}
  0x23   :  { %53 = dma.hbm_to_vmem [thread:$0]  %s711_s2, 256, %s48_s14, [#allocation6], %s607_s29, %s607_s29, %s608_s30  }
  0x24   :  { %s523_s19 = scalar_lea.vmem %s60_s16, 768  ;;  %p528_p2 = scmp.lt.s32.totalorder %s60_s16, %s60_s16 }
  0x25   :  { %p524_p1 = scmp.ne.s32.totalorder %s60_s16, %s523_s19  ;;  %p529_p3 = scmp.lt.s32.totalorder %s523_s19, %s523_s19 }
  0x27   :  { %p530_p4 = por %p529_p3, %p528_p2 }
  0x29   :  { %p531_p5 = pnand %p530_p4, %p524_p1 }
  0x2b   :  { %534 = shalt.err (!%p531_p5)
}
  0x2c   :  { %s611_s0 = smov 64   ;;  %s612_s20 = smov 4  }
  0x2d   :  { %65 = dma.hbm_to_vmem [thread:$0]  %s712_s3, 768, %s60_s16, [#allocation9], %s611_s0, %s611_s0, %s612_s20  }
  0x2e   :  { %595 = dma.done.wait [#allocation3], 256  }
  0x2f   :  { %596 = vsyncadd [#allocation3], 4294967040 }
  0x30   :  { %597 = dma.done.wait [#allocation6], 512  }
  0x31   :  { %598 = vsyncadd [#allocation6], 4294966784 }
  0x32   :  { %599 = dma.done.wait [#allocation9], 768  }
  0x33   :  { %600 = vsyncadd [#allocation9], 4294966528  ;;  %v613_v0 = vmov 0.0   ;;  %vm614_vm0 = vmmov 0   ;;  %v449_v1 = vld [vmem:[#allocation8 + $0x8] sm:$0xff]   ;;  %v450_v2 = vld [vmem:[#allocation8 + $0x18] sm:$0xff]  }
  0x34   :  { %412 = vmatprep.subr.bf16.mxu0 %v613_v0  ;;  %420 = vmatprep.subr.bf16.mxu1 %v613_v0  ;;  %v451_v3 = vld [vmem:[#allocation8] sm:$0xff]   ;;  %v452_v4 = vld [vmem:[#allocation8 + $0x10] sm:$0xff]   ;;  %v82_v6 = vld [vmem:[#allocation2 + $0x8] sm:$0xff]  ;;  %vm113_vm1 = vcmask 261120   ;;  %vm304_vm2 = vcmask 257024   ;;  %s615_s25 = smov [#allocation10]  }
  0x35   :  { %416 = vmatprep.mubr.msk.bf16.mxu0 %vm614_vm0, %v613_v0  ;;  %424 = vmatprep.mubr.msk.bf16.mxu1 %vm614_vm0, %v613_v0  ;;  %v81_v5 = vld [vmem:[#allocation2] sm:$0xff]  ;;  %v453_v8 = vld [vmem:[#allocation8 + $0x28] sm:$0xff]   ;;  %v84_v9 = vld [vmem:[#allocation5] sm:$0xff]  ;;  %s332_s26 = sshll.u32 %s615_s25, 4  ;;  %s616_s27 = smov [#allocation11]   ;;  %s333_s26 = int_to_ptr.vmem [resolvable:$true] %s332_s26 }
  0x36   :  { %413 = vmatpush3.bf16.msra.mxu0 %v449_v1  ;;  %421 = vmatpush3.bf16.msra.mxu1 %v450_v2  ;;  %v83_v7 = vpack.c.bf16 %v82_v6, %v81_v5  ;;  %v85_v10 = vld [vmem:[#allocation5 + $0x8] sm:$0xff]  ;;  %v454_v12 = vld [vmem:[#allocation8 + $0x20] sm:$0xff]   ;;  %v87_v13 = vld [vmem:[#allocation7] sm:$0xff]  ;;  %s344_s28 = sshll.u32 %s616_s27, 4  ;;  %s535_s8 = scalar_lea.vmem %s333_s26, 128  ;;  %s345_s28 = int_to_ptr.vmem [resolvable:$true] %s344_s28 }
  0x37   :  { %414 = vmatprep.subr.bf16.mxu0 %v613_v0  ;;  %422 = vmatprep.subr.bf16.mxu1 %v613_v0  ;;  %v86_v11 = vpack.c.bf16 %v85_v10, %v84_v9  ;;  %v88_v14 = vld [vmem:[#allocation7 + $0x8] sm:$0xff]  ;;  %v377_v16 = vld [vmem:[%s713_s4] ss:$0 sm:$0xff]  ;;  %v382_v17 = vld [vmem:[%s713_s4 + $0x1] ss:$0 sm:$0xff]  ;;  %p536_p6 = scmp.ne.s32.totalorder %s333_s26, %s535_s8  ;;  %p540_p7 = scmp.lt.s32.totalorder %s333_s26, %s333_s26 }
  0x38   :  { %v89_v15 = vpack.c.bf16 %v88_v14, %v87_v13  ;;  %v387_v31 = vld [vmem:[%s713_s4 + $0x2] ss:$0 sm:$0xff]  ;;  %p541_p8 = scmp.lt.s32.totalorder %s535_s8, %s535_s8 }
  0x3a   :  { %415 = vmatpush3.bf16.msra.mxu0 %v451_v3  ;;  %423 = vmatpush3.bf16.msra.mxu1 %v452_v4  ;;  %p542_p9 = por %p541_p8, %p540_p7 }
  0x3b   :  { %428 = vmatprep.subr.bf16.mxu0 %v613_v0 }
  0x3c   :  { %p543_p10 = pnand %p542_p9, %p536_p6 }
  0x3d   :  { %417 = vmatmul.mubr.msk.bf16.vlgmr.msra.gmra.mxu0 %vm113_vm1, %v83_v7  ;;  %425 = vmatmul.mubr.msk.bf16.vlgmr.msra.gmra.mxu1 %vm113_vm1, %v86_v11 }
  0x3e   :  { %429 = vmatpush3.bf16.msra.mxu0 %v453_v8  ;;  %432 = vmatprep.mubr.msk.bf16.mxu0 %vm614_vm0, %v613_v0 }
  0x3f   :  { %430 = vmatprep.subr.bf16.mxu0 %v613_v0 }
  0x42   :  { %431 = vmatpush3.bf16.msra.mxu0 %v454_v12 }
  0x45   :  { %433 = vmatmul.mubr.msk.bf16.vlgmr.msra.gmra.mxu0 %vm113_vm1, %v89_v15 }
  0xfd   :  { %v151_v18 = vpop.f32.mrf.mxu0  ;;  %v220_v20 = vpop.f32.mrf.mxu1 }
  0xfe   :  { %v152_v19 = vadd.f32 %v377_v16, %v151_v18  ;;  %v221_v22 = vadd.f32 %v382_v17, %v220_v20 }
  0xff   :  { %v418_v21 = vpop.f32.mrf.mxu0  ;;  %v426_v24 = vpop.f32.mrf.mxu1 }
 0x100   :  { %v397_v23 = vpack.c.bf16 %v152_v19, %v152_v19  ;;  %v399_v25 = vpack.c.bf16 %v221_v22, %v221_v22 }
 0x101   :  { %v154_v26 = vpop.f32.mrf.mxu0  ;;  %v223_v28 = vpop.f32.mrf.mxu1 }
 0x102   :  { %v155_v27 = vadd.f32 %v377_v16, %v154_v26  ;;  %305 = vst.msk [vmem:[#allocation10] sm:$0xf] %vm304_vm2, %v397_v23  ;;  %v224_v30 = vadd.f32 %v382_v17, %v223_v28  ;;  %315 = vst.msk [vmem:[#allocation11] sm:$0xf] %vm304_vm2, %v399_v25 }
 0x103   :  { %v419_v29 = vpop.f32.mrf.mxu0  ;;  %v427_v33 = vpop.f32.mrf.mxu1 }
 0x104   :  { %v398_v32 = vpack.c.bf16 %v155_v27, %v155_v27  ;;  %v400_v34 = vpack.c.bf16 %v224_v30, %v224_v30 }
 0x105   :  { %v289_v35 = vpop.f32.mrf.mxu0 }
 0x106   :  { %v290_v36 = vadd.f32 %v387_v31, %v289_v35  ;;  %306 = vst.msk [vmem:[#allocation10 + $0x4] sm:$0xf] %vm304_vm2, %v398_v32  ;;  %316 = vst.msk [vmem:[#allocation11 + $0x4] sm:$0xf] %vm304_vm2, %v400_v34 }
 0x107   :  { %v434_v37 = vpop.f32.mrf.mxu0 }
 0x108   :  { %546 = shalt.err (!%p543_p10)
}
 0x109   :  { %338 = dma.vmem_to_hbm [thread:$0]  %s333_s26, 128, %s714_s5, [#allocation4], %s611_s0, %s611_s0, %s612_s20   ;;  %v401_v38 = vpack.c.bf16 %v290_v36, %v290_v36 }
 0x10a   :  { %s555_s10 = scalar_lea.vmem %s345_s28, 128  ;;  %p560_p12 = scmp.lt.s32.totalorder %s345_s28, %s345_s28 }
 0x10b   :  { %p556_p11 = scmp.ne.s32.totalorder %s345_s28, %s555_s10  ;;  %p561_p13 = scmp.lt.s32.totalorder %s555_s10, %s555_s10 }
 0x10d   :  { %p562_p0 = por %p561_p13, %p560_p12 }
 0x10f   :  { %p563_p1 = pnand %p562_p0, %p556_p11 }
 0x111   :  { %566 = shalt.err (!%p563_p1)
}
 0x112   :  { %350 = dma.vmem_to_hbm [thread:$0]  %s345_s28, 128, %s715_s6, [#allocation12], %s611_s0, %s611_s0, %s612_s20   ;;  %v292_v39 = vpop.f32.mrf.mxu0  ;;  %325 = vst.msk [vmem:[#allocation13] sm:$0xf] %vm304_vm2, %v401_v38 }
 0x113   :  { %s617_s13 = smov [#allocation13]   ;;  %v293_v40 = vadd.f32 %v387_v31, %v292_v39 }
 0x114   :  { %s356_s14 = sshll.u32 %s617_s13, 4  ;;  %v435_v41 = vpop.f32.mrf.mxu0  ;;  %s357_s14 = int_to_ptr.vmem [resolvable:$true] %s356_s14 }
 0x115   :  { %v402_v42 = vpack.c.bf16 %v293_v40, %v293_v40  ;;  %s575_s5 = scalar_lea.vmem %s357_s14, 128  ;;  %p580_p3 = scmp.lt.s32.totalorder %s357_s14, %s357_s14 }
 0x116   :  { %p576_p2 = scmp.ne.s32.totalorder %s357_s14, %s575_s5  ;;  %p581_p4 = scmp.lt.s32.totalorder %s575_s5, %s575_s5 }
 0x117   :  { %326 = vst.msk [vmem:[#allocation13 + $0x4] sm:$0xf] %vm304_vm2, %v402_v42 }
 0x118   :  { %p582_p5 = por %p581_p4, %p580_p3 }
 0x11a   :  { %p583_p6 = pnand %p582_p5, %p576_p2 }
 0x11c   :  { %586 = shalt.err (!%p583_p6)
}
 0x11d   :  { %362 = dma.vmem_to_hbm [thread:$0]  %s357_s14, 128, %s716_s7, [#allocation12], %s611_s0, %s611_s0, %s612_s20  }
 0x11e   :  { %601 = dma.done.wait [#allocation4], 128  }
 0x11f   :  { %602 = vsyncadd [#allocation4], 4294967168 }
 0x120   :  { %603 = dma.done.wait [#allocation12], 256  }
 0x121   :  { %604 = vsyncadd [#allocation12], 4294967040 }
 0x122   :  { %372 = vsyncpa [#allocation3], 1 }
 0x123   :  { %373 = vsyncpa [#allocation6], 1 }
 0x124   :  { %374 = vsyncpa [#allocation9], 1 }
 0x125   :  { %375 = vsyncpa [#allocation4], 1 }
 0x126   :  { %376 = vsyncpa [#allocation12], 1 }

</bundles_post_ra>
